<compile_context>
chip_gen: v7x
topology: tpu7x:2x2x1
jax: 0.10.0
libtpu: 0.0.40
codegen_flags: <defaults>
</compile_context>

<pallas_src>
import jax
import jax.numpy as jnp
from jax.experimental import pallas as pl
from jax.experimental.pallas import tpu as pltpu


# Sublane granularity of the (sublane, 128) vreg tiling per dtype itemsize.
_SUBLANES = {4: 8, 2: 16, 1: 32}


def _round_up(x, m):
    return ((x + m - 1) // m) * m


def _vmem_budgets():
    """(scoped vmem limit, per-input-block padded-byte budget), per generation."""
    cap = None
    try:
        cap = pltpu.get_tpu_info().vmem_capacity_bytes
    except Exception:  # info query unavailable -> stay conservative
        cap = None
    if cap is not None and cap >= 96 * 1024 * 1024:
        # v5e / v6e: 128 MiB physical VMEM.
        return 64 * 1024 * 1024, 16 * 1024 * 1024
    # v7x (64 MiB physical VMEM) or unknown.
    return 32 * 1024 * 1024, 8 * 1024 * 1024


def _choose_lane_fold(H, W):
    """Fold factor k: reshape (H, W) -> (H//k, k*W) (contiguous, zero cost).

    Prefer the smallest k | H that makes k*W an exact multiple of 128 (100%
    lane occupancy), then the smallest reaching >= 128 lanes, while keeping
    H//k >= 2 so the kernel still performs most of the reduction."""
    if W % 128 == 0 or H == 1:
        return 1
    divisors = [k for k in range(1, H + 1) if H % k == 0 and H // k >= 2]
    if not divisors:
        return 1
    exact = [k for k in divisors if (k * W) % 128 == 0]
    if exact:
        return exact[0]
    wide = [k for k in divisors if k * W >= 128]
    if wide:
        return wide[0]
    return divisors[-1]  # widest lane dim reachable for this shape


def _dim_tiles(dim, granule):
    """Exact-divisor tile sizes: multiples of `granule`, plus the full dim.
    Sorted descending (largest first)."""
    cands = {dim}
    t = granule
    while t <= dim:
        if dim % t == 0:
            cands.add(t)
        t += granule
    return sorted(cands, reverse=True)


def _padded_in_block_bytes(tb, th, wt, g, itemsize):
    # Mosaic pads the last two block dims to the (sublane, 128) tile.
    return tb * _round_up(th, g) * _round_up(wt, 128) * itemsize


def _choose_tiles(NC, Hr, Wl, itemsize, budget):
    """Largest padded-legal (tb, th, wt) input block within `budget`.

    Shrink rows (tb) first (keeps full-H/full-W contiguous DMA runs), then the
    reduced dim (th), then the lane dim (wt, multiples of 128)."""
    g = _SUBLANES.get(itemsize, 8)
    tb_cands = _dim_tiles(NC, g)      # also legal as the output sublane dim
    th_cands = _dim_tiles(Hr, g)
    wt_cands = _dim_tiles(Wl, 128)

    tb, th, wt = tb_cands[-1], th_cands[-1], wt_cands[-1]
    found = False
    for wt_c in wt_cands:
        for th_c in th_cands:
            for tb_c in tb_cands:
                if _padded_in_block_bytes(tb_c, th_c, wt_c, g, itemsize) <= budget:
                    tb, th, wt = tb_c, th_c, wt_c
                    found = True
                    break
            if found:
                break
        if found:
            break
    # TODO(synk): if nothing fits (pathological shapes where even the minimum
    # legal tile exceeds the budget) we fall through with the smallest legal
    # tiles and rely on a raised vmem limit.

    # v7x has 2 TensorCores: ensure >= 2 parallel blocks when the shape allows
    # it, so both cores stream HBM on this purely bandwidth-bound op.
    if (NC // tb) * (Wl // wt) < 2:
        smaller_tb = [t for t in tb_cands if NC // t >= 2]
        smaller_wt = [t for t in wt_cands if Wl // t >= 2]
        if smaller_tb:
            tb = smaller_tb[0]        # largest candidate that splits the rows
        elif smaller_wt:
            wt = smaller_wt[0]        # otherwise split the lane dim
    return tb, th, wt


def _gmax_kernel_single(x_ref, o_ref):
    # Whole reduced dim resident in a single block: branch-free body.
    o_ref[...] = jnp.max(x_ref[...], axis=1)


def _gmax_kernel_accum(x_ref, o_ref):
    # Output block is resident across the last ("arbitrary") grid axis and
    # acts as a running-max accumulator.
    partial = jnp.max(x_ref[...], axis=1)

    @pl.when(pl.program_id(2) == 0)
    def _init():
        o_ref[...] = partial

    @pl.when(pl.program_id(2) > 0)
    def _accum():
        o_ref[...] = jnp.maximum(o_ref[...], partial)


def gmax_pooling(x):
    """Max-reduce over axis 2 of an NCHW tensor using a Pallas TPU kernel."""
    N, C, H, W = x.shape
    itemsize = jnp.dtype(x.dtype).itemsize

    # Zero-cost layout change: collapse (N, C) into one parallel row axis and
    # fold k rows of H into the lane dimension for lane-dense vregs/stores.
    k = _choose_lane_fold(H, W)
    Hr, Wl = H // k, k * W
    NC = N * C
    x3 = x.reshape(NC, Hr, Wl)

    vmem_limit, block_budget = _vmem_budgets()
    tb, th, wt = _choose_tiles(NC, Hr, Wl, itemsize, block_budget)
    n_h_blocks = Hr // th
    grid = (NC // tb, Wl // wt, n_h_blocks)

    kernel = _gmax_kernel_single if n_h_blocks == 1 else _gmax_kernel_accum

    cost = pl.CostEstimate(
        flops=N * C * H * W,  # one compare per element
        transcendentals=0,
        bytes_accessed=(NC * Hr * Wl + NC * Wl) * itemsize,
    )

    out3 = pl.pallas_call(
        kernel,
        out_shape=jax.ShapeDtypeStruct((NC, Wl), x.dtype),
        grid_spec=pltpu.PrefetchScalarGridSpec(
            num_scalar_prefetch=0,
            grid=grid,
            in_specs=[
                pl.BlockSpec((tb, th, wt), lambda i, j, h: (i, h, j)),
            ],
            # Same output block for every h -> VMEM-resident accumulator.
            out_specs=pl.BlockSpec((tb, wt), lambda i, j, h: (i, j)),
        ),
        compiler_params=pltpu.CompilerParams(
            dimension_semantics=("parallel", "parallel", "arbitrary"),
            vmem_limit_bytes=vmem_limit,
        ),
        cost_estimate=cost,
    )(x3)

    if k == 1:
        return out3.reshape(N, C, W)
    # Tiny epilogue: collapse the k folded rows (array is 1/Hr of the input).
    return jnp.max(out3.reshape(N, C, k, W), axis=2)


if __name__ == "__main__":
    key = jax.random.PRNGKey(0)
    # GMaxPooling.__init__(c1, c2) has no parameters, so nothing to initialize.
    N, C, H, W = 2, 4, 16, 16
    x = jax.random.normal(key, (N, C, H, W), dtype=jnp.float32)

    out = gmax_pooling(x)
    out = jax.block_until_ready(out)

    # Sanity check against plain JAX reference (torch.max(x, dim=2)[0]).
    ref = jnp.max(x, axis=2)
    assert out.shape == (N, C, W), out.shape
    assert jnp.allclose(out, ref), "mismatch vs reference"

    print("KERNEL_OK")
</pallas_src>

<mosaic_0001>
module attributes {stable_mosaic.version = 11 : i64} {
  func.func @_gmax_kernel_single(%arg0: i32, %arg1: i32, %arg2: i32, %arg3: memref<8x2x128xf32, #tpu.memory_space<vmem>>, %arg4: memref<8x128xf32, #tpu.memory_space<vmem>>) attributes {dimension_semantics = [#tpu.dimension_semantics<parallel>, #tpu.dimension_semantics<parallel>, #tpu.dimension_semantics<arbitrary>], iteration_bounds = array<i64: 1, 1, 1>, scalar_prefetch = 0 : i64, scratch_operands = 0 : i64, tpu.core_type = #tpu.core_type<tc>, window_params = [{transform_indices = @transform_0, window_bounds = array<i64: 8, 2, 128>}, {transform_indices = @transform_1, window_bounds = array<i64: 8, 128>}]} {
    %c0 = arith.constant 0 : index
    %c0_0 = arith.constant 0 : index
    %c0_1 = arith.constant 0 : index
    %0 = vector.load %arg3[%c0, %c0_0, %c0_1] : memref<8x2x128xf32, #tpu.memory_space<vmem>>, vector<8x2x128xf32>
    %cst = arith.constant dense<0xFF800000> : vector<8x128xf32>
    %1 = vector.multi_reduction <maximumf>, %0, %cst [1] : vector<8x2x128xf32> to vector<8x128xf32>
    %c0_2 = arith.constant 0 : index
    %c0_3 = arith.constant 0 : index
    %2 = vector.load %arg4[%c0_2, %c0_3] : memref<8x128xf32, #tpu.memory_space<vmem>>, vector<8x128xf32>
    tpu.vector_store %arg4[%c0_2, %c0_3], %1 {strides = array<i32>} : memref<8x128xf32, #tpu.memory_space<vmem>>, vector<8x128xf32>,
    return
  }
  func.func @transform_0(%arg0: i32, %arg1: i32, %arg2: i32) -> (i32, i32, i32) {
    %c0_i32 = arith.constant 0 : i32
    return %arg0, %arg2, %arg1 : i32, i32, i32
  }
  func.func @transform_1(%arg0: i32, %arg1: i32, %arg2: i32) -> (i32, i32) {
    %c0_i32 = arith.constant 0 : i32
    return %arg0, %arg1 : i32, i32
  }
}

</mosaic_0001>

<bundles_post_ra>
// kernel: tpu_custom_call.1
= control target key start
LH: loop header
LB: loop body
LE: loop exit
PB: predicated region body
PF: predicated region fallthrough
CT: control target
= control target key end

     0   :  { %6 = vsyncpa [#allocation3], 0  ;;  %s228_s0 = inlined_call_operand.hbm [shape: f32[8,2,128], index: 0, kind: input, shape index: {}]   ;;  %s229_s1 = inlined_call_operand.hbm [shape: f32[8,128], index: 1, kind: output, shape index: {}]  }
   0x1   :  { %7 = vsyncpa [#allocation4], 0  ;;  %s179_s6 = smov [#allocation2]   ;;  %s131_s10 = scalar_lea.hbm %s228_s0, 256 }
   0x2   :  { %s13_s7 = sshll.u32 %s179_s6, 4  ;;  %p132_p0 = scmp.ne.s32.totalorder %s228_s0, %s131_s10  ;;  %s14_s7 = int_to_ptr.vmem [resolvable:$true] %s13_s7 }
   0x3   :  { %p135_p1 = scmp.lt.u32.totalorder %s131_s10, %s228_s0 }
   0x5   :  { %p137_p2 = pnand %p135_p1, %p132_p0 }
   0x7   :  { %140 = shalt.err (!%p137_p2)
}
   0x8   :  { %s141_s15 = scalar_lea.vmem %s14_s7, 256  ;;  %p146_p4 = scmp.lt.s32.totalorder %s14_s7, %s14_s7 }
   0x9   :  { %p142_p3 = scmp.ne.s32.totalorder %s14_s7, %s141_s15  ;;  %p147_p5 = scmp.lt.s32.totalorder %s141_s15, %s141_s15 }
   0xb   :  { %p148_p6 = por %p147_p5, %p146_p4 }
   0xd   :  { %p149_p7 = pnand %p148_p6, %p142_p3 }
   0xf   :  { %152 = shalt.err (!%p149_p7)
}
  0x10   :  { %s180_s16 = smov 32   ;;  %s181_s17 = smov 2  }
  0x11   :  { %19 = dma.hbm_to_vmem [thread:$0]  %s228_s0, 256, %s14_s7, [#allocation3], %s180_s16, %s180_s16, %s181_s17  }
  0x12   :  { %175 = dma.done.wait [#allocation3], 256  }
  0x13   :  { %176 = vsyncadd [#allocation3], 4294967040  ;;  %vm31_vm0 = vcmask 1041408   ;;  %v23_v0 = vld [vmem:[#allocation2] sm:$0x3]  ;;  %vm96_vm1 = vcmask 1041409  }
  0x14   :  { %v24_v1 = vld [vmem:[#allocation2 + $0x2] sm:$0x3]  ;;  %v25_v2 = vld [vmem:[#allocation2 + $0x4] sm:$0x3]  ;;  %v26_v3 = vld [vmem:[#allocation2 + $0x6] sm:$0x3] }
  0x15   :  { %v27_v4 = vld [vmem:[#allocation2 + $0x8] sm:$0x3]  ;;  %v28_v5 = vld [vmem:[#allocation2 + $0xa] sm:$0x3]  ;;  %v29_v6 = vld [vmem:[#allocation2 + $0xc] sm:$0x3] }
  0x16   :  { %v32_v7 = vsel %vm31_vm0, %v23_v0, -inf  ;;  %v39_v8 = vsel %vm31_vm0, %v24_v1, -inf  ;;  %v30_v9 = vld [vmem:[#allocation2 + $0xe] sm:$0x3]  ;;  %v46_v12 = vsel %vm31_vm0, %v25_v2, -inf  ;;  %v53_v13 = vsel %vm31_vm0, %v26_v3, -inf }
  0x17   :  { %v33_v10 = vrot.slane %v32_v7, 4  ;;  %v40_v11 = vrot.slane %v39_v8, 4  ;;  %v47_v14 = vrot.slane %v46_v12, 4  ;;  %v54_v15 = vrot.slane %v53_v13, 4  ;;  %s182_s0 = smov [#allocation5]  }
  0x18   :  { %v60_v16 = vsel %vm31_vm0, %v27_v4, -inf  ;;  %v67_v17 = vsel %vm31_vm0, %v28_v5, -inf  ;;  %vm98_vm2 = vcmask 1042434   ;;  %v74_v24 = vsel %vm31_vm0, %v29_v6, -inf  ;;  %s118_s20 = sshll.u32 %s182_s0, 4  ;;  %s119_s20 = int_to_ptr.vmem [resolvable:$true] %s118_s20 }
  0x19   :  { %v34_v18 = vmax.f32 %v32_v7, %v33_v10  ;;  %v41_v19 = vmax.f32 %v39_v8, %v40_v11  ;;  %v61_v20 = vrot.slane %v60_v16, 4  ;;  %v68_v21 = vrot.slane %v67_v17, 4  ;;  %s153_s21 = scalar_lea.vmem %s119_s20, 128  ;;  %p158_p9 = scmp.lt.s32.totalorder %s119_s20, %s119_s20 }
  0x1a   :  { %v48_v22 = vmax.f32 %v46_v12, %v47_v14  ;;  %v55_v23 = vmax.f32 %v53_v13, %v54_v15  ;;  %v81_v25 = vsel %vm31_vm0, %v30_v9, -inf  ;;  %vm100_vm3 = vcmask 1043459   ;;  %p154_p8 = scmp.ne.s32.totalorder %s119_s20, %s153_s21  ;;  %p159_p10 = scmp.lt.s32.totalorder %s153_s21, %s153_s21 }
  0x1b   :  { %v35_v26 = vrot.slane %v34_v18, 2  ;;  %v42_v27 = vrot.slane %v41_v19, 2  ;;  %v62_v28 = vmax.f32 %v60_v16, %v61_v20  ;;  %v69_v29 = vmax.f32 %v67_v17, %v68_v21 }
  0x1c   :  { %v49_v30 = vrot.slane %v48_v22, 2  ;;  %v56_v31 = vrot.slane %v55_v23, 2  ;;  %v75_v32 = vrot.slane %v74_v24, 4  ;;  %v82_v33 = vrot.slane %v81_v25, 4  ;;  %p160_p11 = por %p159_p10, %p158_p9 }
  0x1d   :  { %v36_v34 = vmax.f32 %v34_v18, %v35_v26  ;;  %v43_v35 = vmax.f32 %v41_v19, %v42_v27  ;;  %v63_v36 = vrot.slane %v62_v28, 2  ;;  %v70_v37 = vrot.slane %v69_v29, 2 }
  0x1e   :  { %v50_v38 = vmax.f32 %v48_v22, %v49_v30  ;;  %v57_v39 = vmax.f32 %v55_v23, %v56_v31  ;;  %v76_v40 = vmax.f32 %v74_v24, %v75_v32  ;;  %v83_v41 = vmax.f32 %v81_v25, %v82_v33  ;;  %p161_p12 = pnand %p160_p11, %p154_p8 }
  0x1f   :  { %v37_v42 = vrot.slane %v36_v34, 1  ;;  %v44_v43 = vrot.slane %v43_v35, 1  ;;  %v64_v44 = vmax.f32 %v62_v28, %v63_v36  ;;  %v71_v45 = vmax.f32 %v69_v29, %v70_v37 }
  0x20   :  { %v51_v46 = vrot.slane %v50_v38, 1  ;;  %v58_v47 = vrot.slane %v57_v39, 1  ;;  %v77_v48 = vrot.slane %v76_v40, 2  ;;  %v84_v49 = vrot.slane %v83_v41, 2 }
  0x21   :  { %v38_v50 = vmax.f32 %v36_v34, %v37_v42  ;;  %v45_v51 = vmax.f32 %v43_v35, %v44_v43  ;;  %v65_v52 = vrot.slane %v64_v44, 1  ;;  %v72_v53 = vrot.slane %v71_v45, 1 }
  0x22   :  { %v52_v54 = vmax.f32 %v50_v38, %v51_v46  ;;  %v59_v55 = vmax.f32 %v57_v39, %v58_v47  ;;  %v78_v56 = vmax.f32 %v76_v40, %v77_v48  ;;  %v85_v57 = vmax.f32 %v83_v41, %v84_v49 }
  0x23   :  { %v66_v58 = vmax.f32 %v64_v44, %v65_v52  ;;  %v73_v59 = vmax.f32 %v71_v45, %v72_v53  ;;  %v97_v60 = vsel %vm96_vm1, %v45_v51, %v38_v50  ;;  %vm102_vm4 = vcmask 1044484  }
  0x24   :  { %v79_v61 = vrot.slane %v78_v56, 1  ;;  %v86_v62 = vrot.slane %v85_v57, 1  ;;  %v99_v63 = vsel %vm98_vm2, %v52_v54, %v97_v60  ;;  %vm104_vm5 = vcmask 1045509  }
  0x25   :  { %v101_v0 = vsel %vm100_vm3, %v59_v55, %v99_v63  ;;  %vm106_vm6 = vcmask 1046534   ;;  %vm108_vm7 = vcmask 1047559  }
  0x26   :  { %v80_v1 = vmax.f32 %v78_v56, %v79_v61  ;;  %v87_v2 = vmax.f32 %v85_v57, %v86_v62  ;;  %v103_v3 = vsel %vm102_vm4, %v66_v58, %v101_v0 }
  0x27   :  { %v105_v4 = vsel %vm104_vm5, %v73_v59, %v103_v3 }
  0x28   :  { %v107_v5 = vsel %vm106_vm6, %v80_v1, %v105_v4 }
  0x29   :  { %v109_v6 = vsel %vm108_vm7, %v87_v2, %v107_v5 }
  0x2a   :  { %111 = vst [vmem:[#allocation5] sm:$0xff] %v109_v6 }
  0x2b   :  { %164 = shalt.err (!%p161_p12)
}
  0x2c   :  { %s165_s24 = scalar_lea.hbm %s229_s1, 128 }
  0x2d   :  { %p166_p13 = scmp.ne.s32.totalorder %s229_s1, %s165_s24  ;;  %p169_p0 = scmp.lt.u32.totalorder %s165_s24, %s229_s1 }
  0x2f   :  { %p171_p1 = pnand %p169_p0, %p166_p13 }
  0x31   :  { %174 = shalt.err (!%p171_p1)
}
  0x32   :  { %121 = dma.vmem_to_hbm [thread:$0]  %s119_s20, 128, %s229_s1, [#allocation4]  }
  0x33   :  { %177 = dma.done.wait [#allocation4], 128  }
  0x34   :  { %178 = vsyncadd [#allocation4], 4294967168 }
  0x35   :  { %125 = vsyncpa [#allocation3], 1 }
  0x36   :  { %126 = vsyncpa [#allocation4], 1 }

</bundles_post_ra>
